<compile_context>
chip_gen: v5e
topology: v5e:2x2
jax: 0.10.0
libtpu: 0.0.40
codegen_flags: <defaults>
</compile_context>

<pallas_src>
import functools

import jax
import jax.numpy as jnp
from jax import lax
from jax.experimental import pallas as pl
from jax.experimental.pallas import tpu as pltpu


def _round_up(v, m):
    return (v + m - 1) // m * m


# ---------------------------------------------------------------------------
# Kernel 1: fc GEMM  o = x @ wfc + bfc  (bf16 operands, f32 accumulation).
# ---------------------------------------------------------------------------
def fc_kernel(x_ref, w_ref, b_ref, o_ref, acc_ref):
    @pl.when(pl.program_id(2) == 0)
    def _():
        acc_ref[...] = jnp.zeros_like(acc_ref)

    acc_ref[...] += jnp.dot(x_ref[...], w_ref[...],
                            preferred_element_type=jnp.float32)

    @pl.when(pl.program_id(2) == pl.num_programs(2) - 1)
    def _():
        o_ref[...] = acc_ref[...] + b_ref[...]


def fc_forward(x_p, w_p, b_p):
    n_pad, h_pad = x_p.shape
    c_pad = w_p.shape[1]
    tm = n_pad if n_pad <= 256 else 256
    tn = 256 if c_pad % 256 == 0 else 128      # 256-tiles for v6e/v7x MXUs
    tk = 256 if h_pad % 256 == 0 else 128
    grid = (n_pad // tm, c_pad // tn, h_pad // tk)
    return pl.pallas_call(
        fc_kernel,
        out_shape=jax.ShapeDtypeStruct((n_pad, c_pad), jnp.float32),
        grid_spec=pltpu.PrefetchScalarGridSpec(
            num_scalar_prefetch=0,
            grid=grid,
            in_specs=[pl.BlockSpec((tm, tk), lambda i, j, k: (i, k)),
                      pl.BlockSpec((tk, tn), lambda i, j, k: (k, j)),
                      pl.BlockSpec((1, tn), lambda i, j, k: (0, j))],
            out_specs=pl.BlockSpec((tm, tn), lambda i, j, k: (i, j)),
            scratch_shapes=[pltpu.VMEM((tm, tn), jnp.float32)],
        ),
        compiler_params=pltpu.CompilerParams(
            dimension_semantics=("parallel", "parallel", "arbitrary")),
    )(x_p, w_p, b_p)


# ---------------------------------------------------------------------------
# Kernel 2: domain-streaming ASRNormBN1d + final sigmoid.
# grid=(n_domains,): step d streams domain d's (bf16, minimally padded)
# weights, writes one (1, C) scale/shift row; step 0 additionally builds the
# one-hot sufficient statistics on the MXU; the last step gathers the per-row
# parameters by matmul and does the single fused elementwise finalize.
# ---------------------------------------------------------------------------
def asrnorm_kernel(cnt_ref, lam_ref, o_ref, yrow_ref, ycol_ref,
                   wse_ref, wre_ref, wsd_ref, wrd_ref, bias_ref,
                   out_ref,
                   s1_ref, s2c_ref, mu_ref, scale_ref, shift_ref,
                   *, n_domains, d_tab, sm_p, rm_p, eps):
    d = pl.program_id(0)
    n_pad = o_ref.shape[0]
    c_pad = o_ref.shape[1]

    # ---- step 0: one-hot stats (centered 2nd moment) + table init ----------
    @pl.when(d == 0)
    def _():
        o = o_ref[...]
        dom_iota = lax.broadcasted_iota(jnp.int32, (d_tab, n_pad), 0)
        onehot = (yrow_ref[...] == dom_iota).astype(jnp.float32)   # (Dt, N)
        s1 = jnp.dot(onehot, o, preferred_element_type=jnp.float32)
        tot = jnp.maximum(cnt_ref[n_domains], 1.0)
        mu = jnp.sum(s1, axis=0, keepdims=True) / tot               # global mean
        oc = o - mu
        s2c = jnp.dot(onehot, oc * oc, preferred_element_type=jnp.float32)
        s1_ref[...] = s1
        s2c_ref[...] = s2c
        mu_ref[...] = mu
        scale_ref[...] = jnp.zeros_like(scale_ref)
        shift_ref[...] = jnp.zeros_like(shift_ref)

    # ---- per-domain scalars from SMEM --------------------------------------
    cnt = cnt_ref[d]
    lam_mu = lam_ref[4 * d + 0]
    lam_sigma = lam_ref[4 * d + 1]
    lam_beta = lam_ref[4 * d + 2]
    lam_gamma = lam_ref[4 * d + 3]
    row_sel = lax.broadcasted_iota(jnp.int32, (d_tab, 1), 0) == d

    # ---- domains with >1 rows: full ASRNormBN1d -> (1, C) scale/shift row --
    @pl.when(cnt > 1.5)
    def _():
        s1 = s1_ref[pl.ds(d, 1), :]                 # (1, C)
        s2c = s2c_ref[pl.ds(d, 1), :]
        mu = mu_ref[...]
        inv_cnt = 1.0 / cnt
        xm = s1 * inv_cnt                           # batch mean
        dc = xm - mu
        var = jnp.maximum((s2c - cnt * dc * dc) / (cnt - 1.0), 0.0)  # unbiased
        xs = jnp.sqrt(var) + eps                    # sqrt(var) + eps (torch ref)

        # [mean; std] stacked so each shared encoder is one MXU push.
        row0 = lax.broadcasted_iota(jnp.int32, (2, c_pad), 0) == 0
        stacked = jnp.where(row0, jnp.broadcast_to(xm, (2, c_pad)),
                            jnp.broadcast_to(xs, (2, c_pad))).astype(jnp.bfloat16)

        bias = bias_ref[0]                          # (8, C) f32 slab
        bse = bias[0:1, 0:sm_p]
        bre = bias[1:2, 0:rm_p]
        bsmd = bias[2:3, :]
        bssd = bias[3:4, :]
        brb = bias[4:5, :]
        brg = bias[5:6, :]
        bb = bias[6:7, :]
        bg = bias[7:8, :]

        # standard branch: Linear -> ReLU -> Linear (-> ReLU)
        h = jnp.maximum(
            jnp.dot(stacked, wse_ref[0],
                    preferred_element_type=jnp.float32) + bse, 0.0)   # (2, SM)
        wsd = wsd_ref[0]                                              # (2*SM, C)
        x_std_mean = jnp.dot(h[0:1, :].astype(jnp.bfloat16), wsd[0:sm_p, :],
                             preferred_element_type=jnp.float32) + bsmd
        x_std_std = jnp.maximum(
            jnp.dot(h[1:2, :].astype(jnp.bfloat16), wsd[sm_p:2 * sm_p, :],
                    preferred_element_type=jnp.float32) + bssd, 0.0)

        mean = lam_mu * x_std_mean + (1.0 - lam_mu) * xm
        std = lam_sigma * x_std_std + (1.0 - lam_sigma) * xs
        inv_std = 1.0 / std                          # exact; only (1, C)

        # rescale branch: Linear -> ReLU -> Linear -> tanh / sigmoid
        r = jnp.maximum(
            jnp.dot(stacked, wre_ref[0],
                    preferred_element_type=jnp.float32) + bre, 0.0)   # (2, RM)
        wrd = wrd_ref[0]                                              # (2*RM, C)
        beta_raw = jnp.tanh(
            jnp.dot(r[0:1, :].astype(jnp.bfloat16), wrd[0:rm_p, :],
                    preferred_element_type=jnp.float32) + brb)
        gamma_raw = jax.nn.sigmoid(
            jnp.dot(r[1:2, :].astype(jnp.bfloat16), wrd[rm_p:2 * rm_p, :],
                    preferred_element_type=jnp.float32) + brg)
        beta = lam_beta * beta_raw + bb
        gamma = lam_gamma * gamma_raw + bg

        scale = inv_std * gamma
        shift = beta - mean * scale
        scale_ref[...] = jnp.where(row_sel,
                                   jnp.broadcast_to(scale, (d_tab, c_pad)),
                                   scale_ref[...])
        shift_ref[...] = jnp.where(row_sel,
                                   jnp.broadcast_to(shift, (d_tab, c_pad)),
                                   shift_ref[...])

    # ---- singleton domains: pass-through (scale=1, shift stays 0) ----------
    @pl.when(jnp.logical_and(cnt > 0.5, cnt < 1.5))
    def _():
        scale_ref[...] = jnp.where(row_sel, 1.0, scale_ref[...])

    # ---- last step: gather-by-matmul + single fused elementwise pass -------
    @pl.when(d == pl.num_programs(0) - 1)
    def _():
        lane_iota = lax.broadcasted_iota(jnp.int32, (n_pad, d_tab), 1)
        onehot_nd = (ycol_ref[...] == lane_iota).astype(jnp.float32)  # (N, Dt)
        p_scale = jnp.dot(onehot_nd, scale_ref[...],
                          preferred_element_type=jnp.float32)
        p_shift = jnp.dot(onehot_nd, shift_ref[...],
                          preferred_element_type=jnp.float32)
        out_ref[...] = jax.nn.sigmoid(o_ref[...] * p_scale + p_shift)


# ---------------------------------------------------------------------------
# Parameters (matches the PyTorch module layout / constant inits).
# ---------------------------------------------------------------------------
def init_params(key, h_dim, input_dim, n_domains):
    C = input_dim
    SM = max(C // 2, 1)     # stan_mid_channel
    RM = max(C // 16, 1)    # rsc_mid_channel
    keys = jax.random.split(key, 14)

    def w(k, shape, scale=0.1):
        return jax.random.normal(k, shape, jnp.float32) * scale

    params = {
        "wfc_t": w(keys[0], (h_dim, C)),
        "bfc":   w(keys[1], (1, C)),
        "wse_t": w(keys[2], (n_domains, C, SM)),
        "bse":   w(keys[3], (n_domains, 1, SM)),
        "wsmd_t": w(keys[4], (n_domains, SM, C)),
        "bsmd":   w(keys[5], (n_domains, 1, C)),
        "wssd_t": w(keys[6], (n_domains, SM, C)),
        "bssd":   w(keys[7], (n_domains, 1, C)),
        "wre_t": w(keys[8], (n_domains, C, RM)),
        "bre":   w(keys[9], (n_domains, 1, RM)),
        "wrb_t": w(keys[10], (n_domains, RM, C)),
        "brb":   w(keys[11], (n_domains, 1, C)),
        "wrg_t": w(keys[12], (n_domains, RM, C)),
        "brg":   w(keys[13], (n_domains, 1, C)),
    }
    lam_mu = jax.nn.sigmoid(jnp.float32(-3.0))
    lam_bg = jax.nn.sigmoid(jnp.float32(-5.0))
    lam = jnp.stack([lam_mu, lam_mu, lam_bg, lam_bg]).astype(jnp.float32)
    params["lam"] = jnp.broadcast_to(lam, (n_domains, 4))
    params["bias_beta"] = jnp.zeros((n_domains, 1, C), jnp.float32)
    params["bias_gamma"] = jnp.ones((n_domains, 1, C), jnp.float32)
    return params


# ---------------------------------------------------------------------------
# Forward wrapper: padding, packing, and the two pallas_calls.
# ---------------------------------------------------------------------------
def decoder_forward(x, y, params, n_domains, eps=1e-6):
    N, H = x.shape
    C = params["wfc_t"].shape[1]
    SM = params["wse_t"].shape[2]
    RM = params["wre_t"].shape[2]
    D = n_domains

    if N <= 256:
        N_pad = _round_up(N, 8)
    else:
        N_pad = _round_up(N, 256)
    H_pad = _round_up(H, 128)
    C_pad = _round_up(C, 128)
    SM_p = _round_up(SM, 16)    # hidden dims only need sublane/bf16 alignment
    RM_p = _round_up(RM, 16)
    D_tab = _round_up(D, 8)

    def pad2(a, r, c):
        return jnp.pad(a, ((0, r - a.shape[0]), (0, c - a.shape[1])))

    def pad3(a, r, c):
        return jnp.pad(a, ((0, 0), (0, r - a.shape[1]), (0, c - a.shape[2])))

    # ---- kernel 1: fc GEMM (bf16 operands) ----------------------------------
    x_p = pad2(x, N_pad, H_pad).astype(jnp.bfloat16)
    wfc_p = pad2(params["wfc_t"], H_pad, C_pad).astype(jnp.bfloat16)
    bfc_p = pad2(params["bfc"], 1, C_pad).astype(jnp.float32)
    o = fc_forward(x_p, wfc_p, bfc_p)                      # (N_pad, C_pad) f32

    # ---- labels / per-domain counts -----------------------------------------
    y_i = y.astype(jnp.int32).reshape(N)
    if N_pad > N:
        # padded rows get an invalid domain id so they match no domain
        y_i = jnp.concatenate([y_i, jnp.full((N_pad - N,), -1, jnp.int32)])
    y_row = y_i.reshape(1, N_pad)
    y_col = y_i.reshape(N_pad, 1)
    counts = jnp.sum(y_row == jnp.arange(D, dtype=jnp.int32)[:, None],
                     axis=1).astype(jnp.float32)           # (D,)
    cnt_tot = jnp.concatenate([counts, jnp.sum(counts, keepdims=True)])
    lam_flat = params["lam"].reshape(-1).astype(jnp.float32)

    # ---- per-domain weights: bf16, minimal padding, packed slabs ------------
    wse = pad3(params["wse_t"], C_pad, SM_p).astype(jnp.bfloat16)
    wre = pad3(params["wre_t"], C_pad, RM_p).astype(jnp.bfloat16)
    wsd = jnp.concatenate([pad3(params["wsmd_t"], SM_p, C_pad),
                           pad3(params["wssd_t"], SM_p, C_pad)],
                          axis=1).astype(jnp.bfloat16)      # (D, 2*SM_p, C_pad)
    wrd = jnp.concatenate([pad3(params["wrb_t"], RM_p, C_pad),
                           pad3(params["wrg_t"], RM_p, C_pad)],
                          axis=1).astype(jnp.bfloat16)      # (D, 2*RM_p, C_pad)
    bias_slab = jnp.concatenate(
        [pad3(params["bse"], 1, C_pad),          # row 0
         pad3(params["bre"], 1, C_pad),          # row 1
         pad3(params["bsmd"], 1, C_pad),         # row 2
         pad3(params["bssd"], 1, C_pad),         # row 3
         pad3(params["brb"], 1, C_pad),          # row 4
         pad3(params["brg"], 1, C_pad),          # row 5
         pad3(params["bias_beta"], 1, C_pad),    # row 6
         pad3(params["bias_gamma"], 1, C_pad)],  # row 7
        axis=1).astype(jnp.float32)                         # (D, 8, C_pad)

    # ---- VMEM budget: 1.5x resident estimate, clamped to 0.85 * physical ----
    in_vmem = 2 * (N_pad * C_pad * 4
                   + 2 * N_pad * 4
                   + C_pad * (SM_p + RM_p) * 2
                   + 2 * (SM_p + RM_p) * C_pad * 2
                   + 8 * C_pad * 4)
    out_vmem = 2 * N_pad * C_pad * 4
    scratch_vmem = (4 * D_tab + 8) * C_pad * 4
    est = in_vmem + out_vmem + scratch_vmem
    try:
        cap = int(pltpu.get_tpu_info().vmem_capacity_bytes)
    except Exception:
        cap = 64 * 1024 * 1024                   # v7x per-TensorCore VMEM
    vmem_limit = int(min(int(0.85 * cap),
                         max(16 * 1024 * 1024, int(1.5 * est))))

    smem = pl.BlockSpec(memory_space=pltpu.MemorySpace.SMEM)

    def const2(shape):
        return pl.BlockSpec(shape, lambda d: (0, 0))

    def dom3(shape):
        return pl.BlockSpec((1,) + shape, lambda d: (d, 0, 0))

    kern = functools.partial(asrnorm_kernel, n_domains=D, d_tab=D_tab,
                             sm_p=SM_p, rm_p=RM_p, eps=eps)
    out_pad = pl.pallas_call(
        kern,
        out_shape=jax.ShapeDtypeStruct((N_pad, C_pad), jnp.float32),
        grid_spec=pltpu.PrefetchScalarGridSpec(
            num_scalar_prefetch=0,
            grid=(D,),
            in_specs=[
                smem,                            # counts (+ total)
                smem,                            # lambdas
                const2((N_pad, C_pad)),          # o = fc(x)
                const2((1, N_pad)),              # y (row layout, stats onehot)
                const2((N_pad, 1)),              # y (col layout, gather onehot)
                dom3((C_pad, SM_p)),             # standard encoder   (bf16)
                dom3((C_pad, RM_p)),             # rescale encoder    (bf16)
                dom3((2 * SM_p, C_pad)),         # std mean|std decoders (bf16)
                dom3((2 * RM_p, C_pad)),         # beta|gamma decoders   (bf16)
                dom3((8, C_pad)),                # packed bias slab      (f32)
            ],
            out_specs=pl.BlockSpec((N_pad, C_pad), lambda d: (0, 0)),
            scratch_shapes=[
                pltpu.VMEM((D_tab, C_pad), jnp.float32),   # S1
                pltpu.VMEM((D_tab, C_pad), jnp.float32),   # centered S2
                pltpu.VMEM((1, C_pad), jnp.float32),       # global mean
                pltpu.VMEM((D_tab, C_pad), jnp.float32),   # scale table
                pltpu.VMEM((D_tab, C_pad), jnp.float32),   # shift table
            ],
        ),
        compiler_params=pltpu.CompilerParams(
            dimension_semantics=("arbitrary",),
            vmem_limit_bytes=vmem_limit,
        ),
    )(cnt_tot, lam_flat, o, y_row, y_col, wse, wre, wsd, wrd, bias_slab)

    return out_pad[:N, :C]


if __name__ == "__main__":
    key = jax.random.PRNGKey(0)
    N, H, C, D = 8, 32, 64, 2   # batch, h_dim, input_dim, n_domains
    kx, ky, kp = jax.random.split(key, 3)
    x = jax.random.normal(kx, (N, H), jnp.float32)
    y = jax.random.randint(ky, (N,), 0, D, dtype=jnp.int32)
    params = init_params(kp, H, C, D)

    out = decoder_forward(x, y, params, n_domains=D)
    jax.block_until_ready(out)
    assert out.shape == (N, C)
    assert bool(jnp.all(jnp.isfinite(out)))
    print("KERNEL_OK")
</pallas_src>

<mosaic_0001>
module attributes {stable_mosaic.version = 11 : i64} {
  func.func @fc_kernel(%arg0: i32, %arg1: i32, %arg2: i32, %arg3: memref<8x128xbf16, #tpu.memory_space<vmem>>, %arg4: memref<128x128xbf16, #tpu.memory_space<vmem>>, %arg5: memref<1x128xf32, #tpu.memory_space<vmem>>, %arg6: memref<8x128xf32, #tpu.memory_space<vmem>>, %arg7: memref<8x128xf32, #tpu.memory_space<vmem>>) attributes {dimension_semantics = [#tpu.dimension_semantics<parallel>, #tpu.dimension_semantics<parallel>, #tpu.dimension_semantics<arbitrary>], iteration_bounds = array<i64: 1, 1, 1>, scalar_prefetch = 0 : i64, scratch_operands = 1 : i64, tpu.core_type = #tpu.core_type<tc>, window_params = [{transform_indices = @transform_0, window_bounds = array<i64: 8, 128>}, {transform_indices = @transform_1, window_bounds = array<i64: 128, 128>}, {transform_indices = @transform_2, window_bounds = array<i64: 1, 128>}, {transform_indices = @transform_3, window_bounds = array<i64: 8, 128>}]} {
    %c0_i32 = arith.constant 0 : i32
    %0 = arith.cmpi eq, %arg2, %c0_i32 : i32
    %1 = arith.extui %0 : i1 to i32
    %c0_i32_0 = arith.constant 0 : i32
    %2 = arith.cmpi ne, %1, %c0_i32_0 : i32
    scf.if %2 {
      %cst_10 = arith.constant 0.000000e+00 : f32
      %12 = vector.broadcast %cst_10 : f32 to vector<8x128xf32>
      %c0_11 = arith.constant 0 : index
      %c0_12 = arith.constant 0 : index
      %13 = vector.load %arg7[%c0_11, %c0_12] : memref<8x128xf32, #tpu.memory_space<vmem>>, vector<8x128xf32>
      tpu.vector_store %arg7[%c0_11, %c0_12], %12 {strides = array<i32>} : memref<8x128xf32, #tpu.memory_space<vmem>>, vector<8x128xf32>,
    } else {
    }
    %c0 = arith.constant 0 : index
    %c0_1 = arith.constant 0 : index
    %3 = vector.load %arg7[%c0, %c0_1] : memref<8x128xf32, #tpu.memory_space<vmem>>, vector<8x128xf32>
    %c0_2 = arith.constant 0 : index
    %c0_3 = arith.constant 0 : index
    %4 = vector.load %arg3[%c0_2, %c0_3] : memref<8x128xbf16, #tpu.memory_space<vmem>>, vector<8x128xbf16>
    %c0_4 = arith.constant 0 : index
    %c0_5 = arith.constant 0 : index
    %5 = vector.load %arg4[%c0_4, %c0_5] : memref<128x128xbf16, #tpu.memory_space<vmem>>, vector<128x128xbf16>
    %cst = arith.constant dense<0.000000e+00> : vector<8x128xf32>
    %6 = tpu.matmul %4, %5, %cst {dimension_numbers = #tpu.dot_dimension_numbers<[1], [0], [0], [1], [0, 0, 1, 1], [], []>} : vector<8x128xbf16>, vector<128x128xbf16>, vector<8x128xf32> -> vector<8x128xf32>
    %7 = arith.addf %3, %6 : vector<8x128xf32>
    %c0_6 = arith.constant 0 : index
    %c0_7 = arith.constant 0 : index
    %8 = vector.load %arg7[%c0_6, %c0_7] : memref<8x128xf32, #tpu.memory_space<vmem>>, vector<8x128xf32>
    tpu.vector_store %arg7[%c0_6, %c0_7], %7 {strides = array<i32>} : memref<8x128xf32, #tpu.memory_space<vmem>>, vector<8x128xf32>,
    %c0_i32_8 = arith.constant 0 : i32
    %9 = arith.cmpi eq, %arg2, %c0_i32_8 : i32
    %10 = arith.extui %9 : i1 to i32
    %c0_i32_9 = arith.constant 0 : i32
    %11 = arith.cmpi ne, %10, %c0_i32_9 : i32
    scf.if %11 {
      %c0_10 = arith.constant 0 : index
      %c0_11 = arith.constant 0 : index
      %12 = vector.load %arg7[%c0_10, %c0_11] : memref<8x128xf32, #tpu.memory_space<vmem>>, vector<8x128xf32>
      %c0_12 = arith.constant 0 : index
      %c0_13 = arith.constant 0 : index
      %13 = vector.load %arg5[%c0_12, %c0_13] : memref<1x128xf32, #tpu.memory_space<vmem>>, vector<1x128xf32>
      %14 = vector.broadcast %13 : vector<1x128xf32> to vector<8x128xf32>
      %15 = arith.addf %12, %14 : vector<8x128xf32>
      %c0_14 = arith.constant 0 : index
      %c0_15 = arith.constant 0 : index
      %16 = vector.load %arg6[%c0_14, %c0_15] : memref<8x128xf32, #tpu.memory_space<vmem>>, vector<8x128xf32>
      tpu.vector_store %arg6[%c0_14, %c0_15], %15 {strides = array<i32>} : memref<8x128xf32, #tpu.memory_space<vmem>>, vector<8x128xf32>,
    } else {
    }
    return
  }
  func.func @transform_0(%arg0: i32, %arg1: i32, %arg2: i32) -> (i32, i32) {
    %c0_i32 = arith.constant 0 : i32
    return %arg0, %arg2 : i32, i32
  }
  func.func @transform_1(%arg0: i32, %arg1: i32, %arg2: i32) -> (i32, i32) {
    %c0_i32 = arith.constant 0 : i32
    return %arg2, %arg1 : i32, i32
  }
  func.func @transform_2(%arg0: i32, %arg1: i32, %arg2: i32) -> (i32, i32) {
    %c0_i32 = arith.constant 0 : i32
    %c0_i32_0 = arith.constant 0 : i32
    return %c0_i32, %arg1 : i32, i32
  }
  func.func @transform_3(%arg0: i32, %arg1: i32, %arg2: i32) -> (i32, i32) {
    %c0_i32 = arith.constant 0 : i32
    return %arg0, %arg1 : i32, i32
  }
}

</mosaic_0001>

<bundles_post_ra>
// kernel: tpu_custom_call.1
= control target key start
LH: loop header
LB: loop body
LE: loop exit
PB: predicated region body
PF: predicated region fallthrough
CT: control target
= control target key end

     0   :  { %8 = vsyncpa [#allocation4], 0  ;;  %s320_s0 = inlined_call_operand.hbm [shape: bf16[8,128], index: 0, kind: input, shape index: {}]   ;;  %s321_s1 = inlined_call_operand.hbm [shape: bf16[128,128], index: 1, kind: input, shape index: {}]   ;;  %s322_s2 = inlined_call_operand.vmem [shape: f32[1,128], index: 2, kind: input, shape index: {}]   ;;  %s323_s3 = inlined_call_operand.hbm [shape: f32[8,128], index: 3, kind: output, shape index: {}]  }
   0x1   :  { %9 = vsyncpa [#allocation7], 0 }
   0x2   :  { %10 = vsyncpa [#allocation5], 0  ;;  %s16_s14 = sshll.u32 %s320_s0, 4  ;;  %s283_s15 = smov [#allocation3]   ;;  %s17_s14 = int_to_ptr.hbm [resolvable:$true] %s16_s14 }
   0x3   :  { %s18_s16 = sshll.u32 %s283_s15, 4  ;;  %s26_s19 = sshll.u32 %s321_s1, 4  ;;  %s19_s16 = int_to_ptr.vmem [resolvable:$true] %s18_s16  ;;  %s27_s19 = int_to_ptr.hbm [resolvable:$true] %s26_s19 }
   0x4   :  { %21 = dma.hbm_to_vmem [thread:$0]  %s17_s14, 64, %s19_s16, [#allocation4]  }
   0x5   :  { %s284_s20 = smov [#allocation6]   ;;  %s285_s22 = smov 64  }
   0x6   :  { %s28_s21 = sshll.u32 %s284_s20, 4  ;;  %s286_s23 = smov 4   ;;  %s29_s21 = int_to_ptr.vmem [resolvable:$true] %s28_s21 }
   0x7   :  { %34 = dma.hbm_to_vmem [thread:$0]  %s27_s19, 1024, %s29_s21, [#allocation7], %s285_s22, %s285_s22, %s286_s23  }
   0x8   :  { %277 = dma.done.wait [#allocation4], 64  }
   0x9   :  { %278 = vsyncadd [#allocation4], 4294967232 }
   0xa   :  { %279 = dma.done.wait [#allocation7], 1024  }
   0xb   :  { %280 = vsyncadd [#allocation7], 4294966272  ;;  %v198_v0 = vld [vmem:[#allocation6 + $0x38] sm:$0xff]  ;;  %v197_v1 = vld [vmem:[#allocation6 + $0x30] sm:$0xff]  ;;  %s287_s24 = smov [#allocation8]   ;;  %s148_s28 = sshll.u32 %s323_s3, 4  ;;  %s149_s28 = int_to_ptr.hbm [resolvable:$true] %s148_s28 }
   0xc   :  { %116 = vmatpush.bf16.msra.mxu0 %v198_v0  ;;  %v196_v2 = vld [vmem:[#allocation6 + $0x28] sm:$0xff]  ;;  %v195_v3 = vld [vmem:[#allocation6 + $0x20] sm:$0xff]  ;;  %v194_v4 = vld [vmem:[#allocation6 + $0x18] sm:$0xff]  ;;  %s146_s25 = sshll.u32 %s287_s24, 4  ;;  %s147_s25 = int_to_ptr.vmem [resolvable:$true] %s146_s25 }
   0xd   :  { %v193_v5 = vld [vmem:[#allocation6 + $0x10] sm:$0xff]  ;;  %v192_v6 = vld [vmem:[#allocation6 + $0x8] sm:$0xff]  ;;  %v191_v7 = vld [vmem:[#allocation6] sm:$0xff] }
   0xe   :  { %v51_v8 = vld [vmem:[#allocation3] sm:$0xf] }
   0xf   :  { %v204_v9 = vld [vmem:[%s322_s2] ss:$0 sm:$0xff] }
  0x10   :  { %117 = vmatpush.bf16.msra.mxu0 %v197_v1 }
  0x14   :  { %118 = vmatpush.bf16.msra.mxu0 %v196_v2 }
  0x18   :  { %119 = vmatpush.bf16.msra.mxu0 %v195_v3 }
  0x1c   :  { %120 = vmatpush.bf16.msra.mxu0 %v194_v4 }
  0x20   :  { %121 = vmatpush.bf16.msra.mxu0 %v193_v5 }
  0x24   :  { %122 = vmatpush.bf16.msra.mxu0 %v192_v6 }
  0x28   :  { %123 = vmatpush.bf16.msra.mxu0 %v191_v7 }
  0x2b   :  { %124 = vmatmul.bf16.vlgmr.msra.gmra.mxu0 %v51_v8 }
  0xa8   :  { %v125_v10 = vpop.f32.mrf.mxu0 }
  0xa9   :  { %v139_v11 = vadd.f32 %v204_v9, %v125_v10 }
  0xab   :  { %140 = vst [vmem:[#allocation8] sm:$0xff] %v139_v11 }
  0xac   :  { %151 = dma.vmem_to_hbm [thread:$0]  %s147_s25, 128, %s149_s28, [#allocation5]  }
  0xb0   :  { %v127_v12 = vpop.f32.mrf.mxu0 }
  0xb1   :  { %281 = dma.done.wait [#allocation5], 128  }
  0xb2   :  { %282 = vsyncadd [#allocation5], 4294967168 }
  0xb3   :  { %156 = vsyncpa [#allocation4], 1 }
  0xb4   :  { %157 = vsyncpa [#allocation7], 1 }
  0xb5   :  { %158 = vsyncpa [#allocation5], 1 }

</bundles_post_ra>
